<compile_context>
chip_gen: v6e
topology: v6e:2x2x1
jax: 0.10.0
libtpu: 0.0.40
codegen_flags: <defaults>
</compile_context>

<pallas_src>
import math
import functools

import jax
import jax.numpy as jnp
from jax import lax
from jax.experimental import pallas as pl
from jax.experimental.pallas import tpu as pltpu


# Table (in its original dtype) up to this size may live fully in VMEM
# (double-buffered by the pipeliner it is still well under the 32 MiB scoped
# default on v5e/v6e/v7x).
_VMEM_TABLE_BYTES = 8 * 1024 * 1024
# One-hot MXU gather only for vocabularies up to this size (conservative for
# v5e's 197 TF/s MXU; can be raised to ~2-4K on v6e/v7x).
_ONEHOT_VOCAB_CAP = 1024
# Outstanding row DMAs in the manual-gather path (power of two).
_DMA_SLOTS = 16
# Bound on how many token ids are scalar-prefetched into SMEM per call
# (1-D SMEM pads to next_pow2(4N) bytes -> 32768 ids == 128 KiB).
_MAX_IDS_PER_CALL = 32768


def _round_up(x, m):
    return ((x + m - 1) // m) * m


# ---------------------------------------------------------------------------
# Path A: tiny vocabulary -> bf16 table resident in VMEM, gather == one-hot
# bf16 MXU matmul with f32 accumulation.  One grid step handles TOK tokens.
# ---------------------------------------------------------------------------
def _embed_onehot_kernel(ids_ref, tbl_ref, out_ref, *, scale):
    # ids_ref: (TOK, 1) int32   tbl_ref: (V, D) bf16   out_ref: (TOK, D)
    tok = out_ref.shape[0]
    vocab = tbl_ref.shape[0]
    ids = ids_ref[...]                                       # (TOK, 1)
    col = lax.broadcasted_iota(jnp.int32, (tok, vocab), 1)   # (TOK, V)
    one_hot = (ids == col).astype(tbl_ref.dtype)             # exact 0/1 in bf16
    acc = jnp.dot(one_hot, tbl_ref[...],                     # single MXU pass
                  preferred_element_type=jnp.float32)
    out_ref[...] = (acc * scale).astype(out_ref.dtype)


def _embed_onehot(flat_ids, table_lo, scale, tok_block, out_dtype):
    n = flat_ids.shape[0]
    v, d = table_lo.shape
    n_pad = _round_up(n, tok_block)
    ids = jnp.pad(flat_ids, (0, n_pad - n)).reshape(n_pad, 1)

    out = pl.pallas_call(
        functools.partial(_embed_onehot_kernel, scale=scale),
        out_shape=jax.ShapeDtypeStruct((n_pad, d), out_dtype),
        grid_spec=pltpu.PrefetchScalarGridSpec(
            num_scalar_prefetch=0,
            grid=(n_pad // tok_block,),
            in_specs=[
                pl.BlockSpec((tok_block, 1), lambda i: (i, 0)),  # token ids
                pl.BlockSpec((v, d), lambda i: (0, 0)),          # whole table
            ],
            out_specs=pl.BlockSpec((tok_block, d), lambda i: (i, 0)),
        ),
        compiler_params=pltpu.CompilerParams(
            dimension_semantics=("parallel",),
        ),
    )(ids, table_lo)
    return out[:n]


# ---------------------------------------------------------------------------
# Path B: mid-size table -> table VMEM-resident (constant index_map, fetched
# once), rows gathered with dynamic sublane slices, scale applied in one
# vectorized pass.  Exact for any table dtype.
# ---------------------------------------------------------------------------
def _embed_vmem_gather_kernel(ids_smem, tbl_ref, out_ref, *, scale, tok_block):
    base = pl.program_id(0) * tok_block

    def body(t, carry):
        row = ids_smem[base + t]
        out_ref[pl.ds(t, 1), :] = tbl_ref[pl.ds(row, 1), :]
        return carry

    lax.fori_loop(0, tok_block, body, 0, unroll=8)
    # One vectorized sqrt(D) scale over the dense (TOK, D) tile.
    out_ref[...] = (out_ref[...].astype(jnp.float32) * scale).astype(out_ref.dtype)


def _embed_vmem_gather(flat_ids, table, scale, tok_block):
    n = flat_ids.shape[0]
    v, d = table.shape
    n_pad = _round_up(n, tok_block)
    ids = jnp.pad(flat_ids, (0, n_pad - n))   # pad with id 0 (valid row)

    out = pl.pallas_call(
        functools.partial(_embed_vmem_gather_kernel, scale=scale,
                          tok_block=tok_block),
        out_shape=jax.ShapeDtypeStruct((n_pad, d), table.dtype),
        grid_spec=pltpu.PrefetchScalarGridSpec(
            num_scalar_prefetch=1,                              # ids -> SMEM
            grid=(n_pad // tok_block,),
            in_specs=[pl.BlockSpec((v, d), lambda i, ids_ref: (0, 0))],
            out_specs=pl.BlockSpec((tok_block, d), lambda i, ids_ref: (i, 0)),
        ),
        compiler_params=pltpu.CompilerParams(
            dimension_semantics=("parallel",),
        ),
    )(ids, table)
    return out[:n]


# ---------------------------------------------------------------------------
# Path C: large table -> table stays in HBM; each chunk gathers its rows with a
# ring of _DMA_SLOTS outstanding async copies DIRECTLY into out_ref, then the
# sqrt(D) scale is applied in place.
# ---------------------------------------------------------------------------
def _embed_dma_kernel(ids_smem, tbl_hbm, out_ref, sem, *,
                      scale, tok_block, n_slots):
    # ids_smem: (N_pad,) int32 in SMEM (scalar prefetch)
    # tbl_hbm : (V, D) in HBM (memory_space=pl.ANY)
    # out_ref : (TOK, D) VMEM output tile (also the DMA destination)
    # sem     : (n_slots,) DMA semaphores, one per in-flight row copy
    base = pl.program_id(0) * tok_block

    def start_row(t, row, slot):
        pltpu.make_async_copy(
            tbl_hbm.at[pl.ds(row, 1)], out_ref.at[pl.ds(t, 1)], sem.at[slot]
        ).start()

    def wait_slot(slot):
        # NOTE: every started copy is an identical (1, D) row transfer of the
        # same dtype, so this placeholder descriptor carries exactly the right
        # transfer size for the semaphore wait.  Keep shapes in sync if the
        # row transfer ever changes.
        pltpu.make_async_copy(
            tbl_hbm.at[pl.ds(0, 1)], out_ref.at[pl.ds(0, 1)], sem.at[slot]
        ).wait()

    # Prime a ring of n_slots outstanding row copies (tok_block >= n_slots).
    for t in range(n_slots):
        start_row(t, ids_smem[base + t], t)

    def body(t, carry):
        slot = t & (n_slots - 1)
        # Read the id BEFORE the wait: a DMA wait breaks SMEM sst->sld
        # forwarding, so scalar address math overlaps the wait instead of
        # serializing behind it.
        row = ids_smem[base + t]
        wait_slot(slot)            # copy for token (t - n_slots) has landed
        start_row(t, row, slot)
        return carry

    lax.fori_loop(n_slots, tok_block, body, 0, unroll=8)

    # Drain the remaining in-flight copies.
    for slot in range(n_slots):
        wait_slot(slot)

    # One vectorized sqrt(D) scale in place over the gathered (TOK, D) tile.
    out_ref[...] = (out_ref[...].astype(jnp.float32) * scale).astype(out_ref.dtype)


def _embed_dma_gather(flat_ids, table, scale, tok_block):
    n = flat_ids.shape[0]
    v, d = table.shape
    n_pad = _round_up(n, tok_block)
    ids = jnp.pad(flat_ids, (0, n_pad - n))   # pad with id 0 (valid row)
    n_slots = _DMA_SLOTS if tok_block >= _DMA_SLOTS else 8

    out = pl.pallas_call(
        functools.partial(_embed_dma_kernel, scale=scale,
                          tok_block=tok_block, n_slots=n_slots),
        out_shape=jax.ShapeDtypeStruct((n_pad, d), table.dtype),
        grid_spec=pltpu.PrefetchScalarGridSpec(
            num_scalar_prefetch=1,                            # ids -> SMEM
            grid=(n_pad // tok_block,),
            in_specs=[pl.BlockSpec(memory_space=pl.ANY)],     # table in HBM
            out_specs=pl.BlockSpec((tok_block, d), lambda i, ids_ref: (i, 0)),
            scratch_shapes=[pltpu.SemaphoreType.DMA((n_slots,))],
        ),
        compiler_params=pltpu.CompilerParams(
            dimension_semantics=("parallel",),
        ),
    )(ids, table)
    return out[:n]


def _run_chunked(fn, flat_ids, table, scale, tok_block):
    """Bound the SMEM scalar-prefetch footprint for very long sequences."""
    n = flat_ids.shape[0]
    if n <= _MAX_IDS_PER_CALL:
        return fn(flat_ids, table, scale, tok_block)
    pieces = []
    for s in range(0, n, _MAX_IDS_PER_CALL):
        pieces.append(fn(flat_ids[s:s + _MAX_IDS_PER_CALL], table, scale,
                         tok_block))
    return jnp.concatenate(pieces, axis=0)


# ---------------------------------------------------------------------------
# Public forward: Embeddings(x) = embed_table[x] * sqrt(D)
# ---------------------------------------------------------------------------
def embeddings_forward(token_ids, embed_table, *, tok_block=None,
                       gather_mode=None,
                       onehot_vocab_cap=_ONEHOT_VOCAB_CAP,
                       vmem_table_bytes=_VMEM_TABLE_BYTES):
    """token_ids: int array of any shape; embed_table: (V, D).
    Returns token_ids.shape + (D,) embeddings scaled by sqrt(D).

    gather_mode: None (auto) | "onehot" (bf16 MXU gather, tiny vocab)
                 | "vmem" (exact VMEM-resident gather) | "dma" (HBM row DMAs).
    """
    v, d = embed_table.shape
    scale = float(math.sqrt(d))
    ids_shape = token_ids.shape
    out_dtype = embed_table.dtype
    flat_ids = token_ids.reshape(-1).astype(jnp.int32)
    # Clamp untrusted ids: never turn a bad id into an out-of-range row access.
    flat_ids = jnp.clip(flat_ids, 0, v - 1)
    n = flat_ids.shape[0]

    table_bytes = v * d * embed_table.dtype.itemsize
    if gather_mode is None:
        if (v <= onehot_vocab_cap and table_bytes <= vmem_table_bytes
                and jnp.issubdtype(embed_table.dtype, jnp.floating)):
            gather_mode = "onehot"          # MXU one-hot (bf16 precision)
        elif table_bytes <= vmem_table_bytes:
            gather_mode = "vmem"            # exact, table resident in VMEM
        else:
            gather_mode = "dma"             # exact, HBM row-DMA gather

    if tok_block is None:
        tok_block = 512                      # amortizes per-step + DMA-ring cost
    tok_block = _round_up(max(8, min(tok_block, _round_up(n, 8))), 8)

    if gather_mode == "onehot":
        # Single bf16 MXU pass; selector is exact 0/1 in bf16.  Use
        # gather_mode="vmem" for a bit-exact gather of f32 tables.
        table_lo = (embed_table if embed_table.dtype.itemsize <= 2
                    else embed_table.astype(jnp.bfloat16))
        out_flat = _embed_onehot(flat_ids, table_lo, scale, tok_block, out_dtype)
    elif gather_mode == "vmem":
        out_flat = _run_chunked(_embed_vmem_gather, flat_ids, embed_table,
                                scale, tok_block)
    else:
        out_flat = _run_chunked(_embed_dma_gather, flat_ids, embed_table,
                                scale, tok_block)
    return out_flat.reshape(*ids_shape, d)


if __name__ == "__main__":
    key = jax.random.PRNGKey(0)
    k1, k2, k3, k4, k5, k6 = jax.random.split(key, 6)

    # ---- Test 1: module-sized shapes (tiny vocab -> bf16 one-hot MXU path) --
    vocab_size, embedding_dims = 32, 32
    batch, seq = 2, 8
    embed_table = jax.random.normal(
        k1, (vocab_size, embedding_dims), dtype=jnp.float32)
    token_ids = jax.random.randint(
        k2, (batch, seq), minval=0, maxval=vocab_size, dtype=jnp.int32)

    out = jax.block_until_ready(embeddings_forward(token_ids, embed_table))
    ref = jnp.take(embed_table, token_ids, axis=0) * math.sqrt(embedding_dims)
    assert out.shape == (batch, seq, embedding_dims)
    # Path A gathers bf16-rounded table values by design (rel err <= 2^-8).
    assert jnp.allclose(out, ref, atol=1e-2, rtol=2e-2)

    # ---- Test 2: mid-size vocab -> exact VMEM-resident gather path ----------
    v2, d2 = 3000, 128
    table2 = jax.random.normal(k3, (v2, d2), dtype=jnp.float32)
    ids2 = jax.random.randint(k4, (batch, seq), minval=0, maxval=v2,
                              dtype=jnp.int32)
    out2 = jax.block_until_ready(embeddings_forward(ids2, table2))
    ref2 = jnp.take(table2, ids2, axis=0) * math.sqrt(d2)
    assert out2.shape == (batch, seq, d2)
    assert jnp.allclose(out2, ref2, atol=1e-6, rtol=1e-6)   # pure copy+scale

    # ---- Test 3: force the manual multi-outstanding-DMA gather path ---------
    v3, d3 = 64, 256
    b3, s3 = 2, 16
    table3 = jax.random.normal(k5, (v3, d3), dtype=jnp.float32)
    ids3 = jax.random.randint(k6, (b3, s3), minval=0, maxval=v3,
                              dtype=jnp.int32)
    out3 = jax.block_until_ready(
        embeddings_forward(ids3, table3, gather_mode="dma"))
    ref3 = jnp.take(table3, ids3, axis=0) * math.sqrt(d3)
    assert out3.shape == (b3, s3, d3)
    assert jnp.allclose(out3, ref3, atol=1e-6, rtol=1e-6)   # pure copy+scale

    print("KERNEL_OK")
</pallas_src>

<mosaic_0001>
module attributes {stable_mosaic.version = 11 : i64} {
  func.func @_embed_onehot_kernel(%arg0: i32, %arg1: memref<16x1xi32, #tpu.memory_space<vmem>>, %arg2: memref<32x32xbf16, #tpu.memory_space<vmem>>, %arg3: memref<16x32xf32, #tpu.memory_space<vmem>>) attributes {dimension_semantics = [#tpu.dimension_semantics<parallel>], iteration_bounds = array<i64: 1>, scalar_prefetch = 0 : i64, scratch_operands = 0 : i64, tpu.core_type = #tpu.core_type<tc>, window_params = [{transform_indices = @transform_0, window_bounds = array<i64: 16, 1>}, {pipeline_mode = #tpu.pipeline_mode<synchronous>, transform_indices = @transform_1, window_bounds = array<i64: 32, 32>}, {transform_indices = @transform_2, window_bounds = array<i64: 16, 32>}]} {
    %c0 = arith.constant 0 : index
    %c0_0 = arith.constant 0 : index
    %0 = vector.load %arg1[%c0, %c0_0] : memref<16x1xi32, #tpu.memory_space<vmem>>, vector<16x1xi32>
    %1 = tpu.iota {dimensions = array<i32: 1>} : vector<16x32xi32>
    %2 = vector.broadcast %0 : vector<16x1xi32> to vector<16x32xi32>
    %3 = arith.cmpi eq, %2, %1 : vector<16x32xi32>
    %4 = arith.extui %3 : vector<16x32xi1> to vector<16x32xi32>
    %5 = arith.sitofp %4 : vector<16x32xi32> to vector<16x32xf32>
    %6 = arith.truncf %5 : vector<16x32xf32> to vector<16x32xbf16>
    %c0_1 = arith.constant 0 : index
    %c0_2 = arith.constant 0 : index
    %7 = vector.load %arg2[%c0_1, %c0_2] : memref<32x32xbf16, #tpu.memory_space<vmem>>, vector<32x32xbf16>
    %cst = arith.constant dense<0.000000e+00> : vector<16x32xf32>
    %8 = tpu.matmul %6, %7, %cst {dimension_numbers = #tpu.dot_dimension_numbers<[1], [0], [0], [1], [0, 0, 1, 1], [], []>} : vector<16x32xbf16>, vector<32x32xbf16>, vector<16x32xf32> -> vector<16x32xf32>
    %cst_3 = arith.constant 5.65685415 : f32
    %9 = vector.broadcast %cst_3 : f32 to vector<16x32xf32>
    %10 = arith.mulf %8, %9 : vector<16x32xf32>
    %c0_4 = arith.constant 0 : index
    %c0_5 = arith.constant 0 : index
    %11 = vector.load %arg3[%c0_4, %c0_5] : memref<16x32xf32, #tpu.memory_space<vmem>>, vector<16x32xf32>
    tpu.vector_store %arg3[%c0_4, %c0_5], %10 {strides = array<i32>} : memref<16x32xf32, #tpu.memory_space<vmem>>, vector<16x32xf32>,
    return
  }
  func.func @transform_0(%arg0: i32) -> (i32, i32) {
    %c0_i32 = arith.constant 0 : i32
    %c0_i32_0 = arith.constant 0 : i32
    return %arg0, %c0_i32 : i32, i32
  }
  func.func @transform_1(%arg0: i32) -> (i32, i32) {
    %c0_i32 = arith.constant 0 : i32
    %c0_i32_0 = arith.constant 0 : i32
    %c0_i32_1 = arith.constant 0 : i32
    return %c0_i32, %c0_i32_0 : i32, i32
  }
  func.func @transform_2(%arg0: i32) -> (i32, i32) {
    %c0_i32 = arith.constant 0 : i32
    %c0_i32_0 = arith.constant 0 : i32
    return %arg0, %c0_i32 : i32, i32
  }
}

</mosaic_0001>

<bundles_post_ra>
// kernel: tpu_custom_call.1
= control target key start
LH: loop header
LB: loop body
LE: loop exit
PB: predicated region body
PF: predicated region fallthrough
CT: control target
= control target key end

     0   :  { %v158_v1 = vmov 0   ;;  %v159_v2 = vmov 0.0   ;;  %s194_s0 = inlined_call_operand.vmem [shape: s32[16,1], index: 0, kind: input, shape index: {}]   ;;  %s195_s1 = inlined_call_operand.vmem [shape: bf16[32,32], index: 1, kind: input, shape index: {}]   ;;  %s196_s2 = inlined_call_operand.hbm [shape: f32[16,32], index: 2, kind: output, shape index: {}]  }
   0x1   :  { %v13_v0 = vld [vmem:[%s194_s0] sm:$0xff]  ;;  %133 = vset.pattern.permute.xlu0 %v158_v1  ;;  %119 = vmatprep.subr.bf16.mxu0 %v159_v2  ;;  %v134_v3 = vld [vmem:[%s195_s1 + $0x8] sm:$0xff]  }
   0x2   :  { %18 = vperm.xlu0 %133, %v13_v0  }
   0x3   :  { %7 = vsyncpa [#allocation3], 0  ;;  %v14_v4 = vld [vmem:[%s194_s0 + $0x8] sm:$0xff]  ;;  %120 = vmatpush3.bf16.msra.mxu0 %v134_v3  ;;  %v135_v5 = vld [vmem:[%s195_s1] sm:$0xff]   ;;  %vm160_vm0 = vmmov 0   ;;  %v15_v6 = vlaneseq  ;;  %vm46_vm3 = vcmask 261120  }
   0x4   :  { %121 = vmatprep.subr.bf16.mxu0 %v159_v2  ;;  %123 = vmatprep.mubr.msk.bf16.mxu0 %vm160_vm0, %v159_v2  ;;  %s161_s0 = smov [#allocation2]  }
   0x5   :  { %v16_v7 = vand.u32 127, %v15_v6  ;;  %s100_s1 = sshll.u32 %s161_s0, 4  ;;  %s101_s1 = int_to_ptr.vmem [resolvable:$true] %s100_s1 }
   0x6   :  { %21 = vperm.xlu0 %133, %v14_v4   ;;  %s136_s17 = scalar_lea.vmem %s101_s1, 256  ;;  %p141_p1 = scmp.lt.s32.totalorder %s101_s1, %s101_s1 }
   0x7   :  { %122 = vmatpush3.bf16.msra.mxu0 %v135_v5  ;;  %p137_p0 = scmp.ne.s32.totalorder %s101_s1, %s136_s17  ;;  %p142_p2 = scmp.lt.s32.totalorder %s136_s17, %s136_s17 }
   0x9   :  { %p143_p3 = por %p142_p2, %p141_p1 }
   0xb   :  { %p144_p4 = pnand %p143_p3, %p137_p0 }
  0x7d   :  { %v19_v8 = vpop.permute.xlu0 %18 }
  0x7e   :  { %vm23_vm1 = vcmp.eq.s32.totalorder %v19_v8, %v16_v7 }
  0x7f   :  { %v111_v10 = vsel %vm23_vm1, 1.0, %v159_v2 }
  0x81   :  { %v22_v9 = vpop.permute.xlu0 %21 }
  0x82   :  { %vm24_vm2 = vcmp.eq.s32.totalorder %v22_v9, %v16_v7 }
  0x83   :  { %v112_v11 = vsel %vm24_vm2, 1.0, %v159_v2 }
  0x84   :  { %v29_v12 = vpack.c.bf16 %v112_v11, %v111_v10 }
  0x86   :  { %124 = vmatmul.mubr.msk.bf16.vlgmr.msra.gmra.mxu0 %vm46_vm3, %v29_v12 }
 0x146   :  { %v84_v13 = vpop.f32.mrf.mxu0 }
 0x147   :  { %v91_v14 = vmul.f32 5.656854, %v84_v13 }
 0x148   :  { %v125_v15 = vpop.f32.mrf.mxu0 }
 0x149   :  { %93 = vst.msk [vmem:[#allocation2] sm:$0xff] %vm46_vm3, %v91_v14 }
 0x14a   :  { %v87_v16 = vpop.f32.mrf.mxu0 }
 0x14b   :  { %v92_v17 = vmul.f32 5.656854, %v87_v16 }
 0x14c   :  { %v126_v18 = vpop.f32.mrf.mxu0 }
 0x14d   :  { %94 = vst.msk [vmem:[#allocation2 + $0x8] sm:$0xff] %vm46_vm3, %v92_v17 }
 0x14e   :  { %147 = shalt.err (!%p144_p4)
}
 0x14f   :  { %s162_s18 = smov 128   ;;  %s163_s19 = smov 8  }
 0x150   :  { %106 = dma.vmem_to_hbm [thread:$0]  %s101_s1, 256, %s196_s2, [#allocation3], %s162_s18, %s162_s18, %s163_s19  }
 0x151   :  { %156 = dma.done.wait [#allocation3], 256  }
 0x152   :  { %157 = vsyncadd [#allocation3], 4294967040 }
 0x153   :  { %110 = vsyncpa [#allocation3], 1 }

</bundles_post_ra>
